<compile_context>
chip_gen: v7x
topology: tpu7x:2x2x1
jax: 0.10.0
libtpu: 0.0.40
codegen_flags: <defaults>
</compile_context>

<pallas_src>
import functools

import jax
import jax.numpy as jnp
from jax.experimental import pallas as pl
from jax.experimental.pallas import tpu as pltpu

_NEG_LARGE = -1e30  # finite "-inf" so padded-column math never produces NaNs


def _clf_ce_loss_kernel(emb_ref, w_ref, b_ref, lab_ref, msk_ref,   # inputs
                        logits_ref, lrow_ref,                      # outputs
                        acc_ref, m_ref, s_ref, p_ref,              # scratch
                        *, block_l):
    j = pl.program_id(1)          # L-tile index
    k = pl.program_id(2)          # D-tile index
    num_l = pl.num_programs(1)
    num_k = pl.num_programs(2)

    @pl.when(k == 0)
    def _zero_acc():
        acc_ref[...] = jnp.zeros_like(acc_ref)

    # MXU: bf16 tiles, f32 accumulation. Weight already laid out (D, L).
    acc_ref[...] += jnp.dot(emb_ref[...], w_ref[...],
                            preferred_element_type=jnp.float32)

    @pl.when(k == num_k - 1)
    def _epilogue():
        # Completed (tm, tn) logits tile. Padded label columns carry a -1e30
        # bias so they contribute nothing to max / logsumexp.
        logits = acc_ref[...] + b_ref[...]
        logits_ref[...] = logits.astype(logits_ref.dtype)

        @pl.when(j == 0)
        def _init_stats():
            m_ref[...] = jnp.full_like(m_ref, _NEG_LARGE)
            s_ref[...] = jnp.zeros_like(s_ref)
            p_ref[...] = jnp.zeros_like(p_ref)

        # Online logsumexp across L tiles (f32 throughout).
        m_prev = m_ref[...]
        m_new = jnp.maximum(m_prev, jnp.max(logits, axis=-1, keepdims=True))
        alpha = jnp.exp(m_prev - m_new)
        s_ref[...] = alpha * s_ref[...] + jnp.sum(
            jnp.exp(logits - m_new), axis=-1, keepdims=True)
        m_ref[...] = m_new

        # Fold the label pick into the same per-L-tile pass.
        labels = lab_ref[...]                                  # (tm, 1) int32
        col = jax.lax.broadcasted_iota(jnp.int32, logits.shape, 1) + j * block_l
        p_ref[...] += jnp.sum(jnp.where(col == labels, logits, 0.0),
                              axis=-1, keepdims=True)

        @pl.when(j == num_l - 1)
        def _finalize():
            lse = m_ref[...] + jnp.log(s_ref[...])
            # Padded batch rows have mask 0 -> contribute 0 to the mean.
            lrow_ref[...] = (lse - p_ref[...]) * msk_ref[...]


def _round_up(x, m):
    return ((x + m - 1) // m) * m


def classifier_clf_loss(embs, weight, bias, labels, *,
                        block_b=256, block_l=256, block_d=512):
    """Fused classifier head + CrossEntropyLoss.

    embs:   (B, D) float   -- 'sentence_embedding'
    weight: (L, D) float   -- nn.Linear weight (num_labels, emb_dim)
    bias:   (L,)   float   -- nn.Linear bias
    labels: (B,)   int     -- class indices in [0, L)

    Returns (loss scalar, logits (B, L) float32).
    """
    B, D = embs.shape
    L = weight.shape[0]

    # Tile sizes: clamp to the (padded) problem, keep MXU / vreg alignment.
    # bm is a multiple of 16 (bf16 sublane pack), bl/bd multiples of 128.
    bm = min(block_b, _round_up(B, 16))
    bl = min(block_l, _round_up(L, 128))
    bd = min(block_d, _round_up(D, 128))
    Bp, Lp, Dp = _round_up(B, bm), _round_up(L, bl), _round_up(D, bd)

    # Pad + cast once in the wrapper (one-time cost; halves matmul DMA bytes).
    embs_p = jnp.zeros((Bp, Dp), jnp.bfloat16).at[:B, :D].set(
        embs.astype(jnp.bfloat16))
    w_t = weight.astype(jnp.bfloat16).T                      # (D, L), one-time
    w_p = jnp.zeros((Dp, Lp), jnp.bfloat16).at[:D, :L].set(w_t)
    bias_p = jnp.full((1, Lp), _NEG_LARGE, jnp.float32).at[0, :L].set(
        bias.astype(jnp.float32))
    labels_p = jnp.zeros((Bp, 1), jnp.int32).at[:B, 0].set(
        labels.astype(jnp.int32))
    mask_p = jnp.zeros((Bp, 1), jnp.float32).at[:B, 0].set(1.0)

    grid = (Bp // bm, Lp // bl, Dp // bd)

    grid_spec = pltpu.PrefetchScalarGridSpec(
        num_scalar_prefetch=0,
        grid=grid,
        in_specs=[
            pl.BlockSpec((bm, bd), lambda i, j, k: (i, k)),   # embs tile (bf16)
            pl.BlockSpec((bd, bl), lambda i, j, k: (k, j)),   # W^T tile (bf16)
            pl.BlockSpec((1, bl), lambda i, j, k: (0, j)),    # bias tile
            pl.BlockSpec((bm, 1), lambda i, j, k: (i, 0)),    # labels
            pl.BlockSpec((bm, 1), lambda i, j, k: (i, 0)),    # row mask
        ],
        out_specs=[
            pl.BlockSpec((bm, bl), lambda i, j, k: (i, j)),   # logits (lane-dense)
            pl.BlockSpec((bm, 1), lambda i, j, k: (i, 0)),    # per-row loss
        ],
        scratch_shapes=[
            pltpu.VMEM((bm, bl), jnp.float32),                # matmul accumulator
            pltpu.VMEM((bm, 1), jnp.float32),                 # running max
            pltpu.VMEM((bm, 1), jnp.float32),                 # running sum-exp
            pltpu.VMEM((bm, 1), jnp.float32),                 # picked logit
        ],
    )

    logits_p, loss_rows = pl.pallas_call(
        functools.partial(_clf_ce_loss_kernel, block_l=bl),
        grid_spec=grid_spec,
        out_shape=(
            jax.ShapeDtypeStruct((Bp, Lp), jnp.float32),
            jax.ShapeDtypeStruct((Bp, 1), jnp.float32),
        ),
        compiler_params=pltpu.CompilerParams(
            dimension_semantics=("parallel", "arbitrary", "arbitrary")),
    )(embs_p, w_p, bias_p, labels_p, mask_p)

    loss = jnp.sum(loss_rows) / B        # tiny cross-tile reduce in the wrapper
    logits = logits_p[:B, :L]
    return loss, logits


if __name__ == "__main__":
    # Small, deterministic shapes consistent with the module:
    #   batch=8 sentences, emb_dim=32, num_labels=8
    B, D, L = 8, 32, 8
    key = jax.random.PRNGKey(0)
    k_emb, k_w, k_lab = jax.random.split(key, 3)

    # "sentence_embedding" (stand-in for SentenceTransformer output)
    embs = jax.random.normal(k_emb, (B, D), dtype=jnp.float32)

    # Classifier params per __init__: weight ~ N(0, 1), bias = 0
    weight = jax.random.normal(k_w, (L, D), dtype=jnp.float32)
    bias = jnp.zeros((L,), dtype=jnp.float32)

    labels = jax.random.randint(k_lab, (B,), 0, L, dtype=jnp.int32)

    loss, logits = classifier_clf_loss(embs, weight, bias, labels)
    loss = jax.block_until_ready(loss)
    logits = jax.block_until_ready(logits)

    # Pure-f32 torch-semantics reference. The kernel feeds the MXU bf16 with
    # f32 accumulation, so tolerances are loosened accordingly.
    ref_logits = embs @ weight.T + bias
    ref_lse = jax.scipy.special.logsumexp(ref_logits, axis=-1)
    ref_loss = jnp.mean(ref_lse - ref_logits[jnp.arange(B), labels])

    assert logits.shape == (B, L)
    assert jnp.allclose(logits, ref_logits, atol=0.25, rtol=0.05), (
        float(jnp.max(jnp.abs(logits - ref_logits))))
    assert jnp.allclose(loss, ref_loss, atol=0.1), (float(loss), float(ref_loss))

    print("KERNEL_OK")
</pallas_src>

<mosaic_0001>
module attributes {stable_mosaic.version = 11 : i64} {
  func.func @_clf_ce_loss_kernel(%arg0: i32, %arg1: i32, %arg2: i32, %arg3: memref<16x128xbf16, #tpu.memory_space<vmem>>, %arg4: memref<128x128xbf16, #tpu.memory_space<vmem>>, %arg5: memref<1x128xf32, #tpu.memory_space<vmem>>, %arg6: memref<16x1xi32, #tpu.memory_space<vmem>>, %arg7: memref<16x1xf32, #tpu.memory_space<vmem>>, %arg8: memref<16x128xf32, #tpu.memory_space<vmem>>, %arg9: memref<16x1xf32, #tpu.memory_space<vmem>>, %arg10: memref<16x128xf32, #tpu.memory_space<vmem>>, %arg11: memref<16x1xf32, #tpu.memory_space<vmem>>, %arg12: memref<16x1xf32, #tpu.memory_space<vmem>>, %arg13: memref<16x1xf32, #tpu.memory_space<vmem>>) attributes {dimension_semantics = [#tpu.dimension_semantics<parallel>, #tpu.dimension_semantics<arbitrary>, #tpu.dimension_semantics<arbitrary>], iteration_bounds = array<i64: 1, 1, 1>, scalar_prefetch = 0 : i64, scratch_operands = 4 : i64, tpu.core_type = #tpu.core_type<tc>, window_params = [{transform_indices = @transform_0, window_bounds = array<i64: 16, 128>}, {transform_indices = @transform_1, window_bounds = array<i64: 128, 128>}, {transform_indices = @transform_2, window_bounds = array<i64: 1, 128>}, {transform_indices = @transform_3, window_bounds = array<i64: 16, 1>}, {transform_indices = @transform_4, window_bounds = array<i64: 16, 1>}, {transform_indices = @transform_5, window_bounds = array<i64: 16, 128>}, {transform_indices = @transform_6, window_bounds = array<i64: 16, 1>}]} {
    %c0_i32 = arith.constant 0 : i32
    %0 = arith.cmpi eq, %arg2, %c0_i32 : i32
    %1 = arith.extui %0 : i1 to i32
    %c0_i32_0 = arith.constant 0 : i32
    %2 = arith.cmpi ne, %1, %c0_i32_0 : i32
    scf.if %2 {
      %cst_10 = arith.constant 0.000000e+00 : f32
      %12 = vector.broadcast %cst_10 : f32 to vector<16x128xf32>
      %c0_11 = arith.constant 0 : index
      %c0_12 = arith.constant 0 : index
      %13 = vector.load %arg10[%c0_11, %c0_12] : memref<16x128xf32, #tpu.memory_space<vmem>>, vector<16x128xf32>
      tpu.vector_store %arg10[%c0_11, %c0_12], %12 {strides = array<i32>} : memref<16x128xf32, #tpu.memory_space<vmem>>, vector<16x128xf32>,
    } else {
    }
    %c0 = arith.constant 0 : index
    %c0_1 = arith.constant 0 : index
    %3 = vector.load %arg10[%c0, %c0_1] : memref<16x128xf32, #tpu.memory_space<vmem>>, vector<16x128xf32>
    %c0_2 = arith.constant 0 : index
    %c0_3 = arith.constant 0 : index
    %4 = vector.load %arg3[%c0_2, %c0_3] : memref<16x128xbf16, #tpu.memory_space<vmem>>, vector<16x128xbf16>
    %c0_4 = arith.constant 0 : index
    %c0_5 = arith.constant 0 : index
    %5 = vector.load %arg4[%c0_4, %c0_5] : memref<128x128xbf16, #tpu.memory_space<vmem>>, vector<128x128xbf16>
    %cst = arith.constant dense<0.000000e+00> : vector<16x128xf32>
    %6 = tpu.matmul %4, %5, %cst {dimension_numbers = #tpu.dot_dimension_numbers<[1], [0], [0], [1], [0, 0, 1, 1], [], []>} : vector<16x128xbf16>, vector<128x128xbf16>, vector<16x128xf32> -> vector<16x128xf32>
    %7 = arith.addf %3, %6 : vector<16x128xf32>
    %c0_6 = arith.constant 0 : index
    %c0_7 = arith.constant 0 : index
    %8 = vector.load %arg10[%c0_6, %c0_7] : memref<16x128xf32, #tpu.memory_space<vmem>>, vector<16x128xf32>
    tpu.vector_store %arg10[%c0_6, %c0_7], %7 {strides = array<i32>} : memref<16x128xf32, #tpu.memory_space<vmem>>, vector<16x128xf32>,
    %c0_i32_8 = arith.constant 0 : i32
    %9 = arith.cmpi eq, %arg2, %c0_i32_8 : i32
    %10 = arith.extui %9 : i1 to i32
    %c0_i32_9 = arith.constant 0 : i32
    %11 = arith.cmpi ne, %10, %c0_i32_9 : i32
    scf.if %11 {
      %c0_10 = arith.constant 0 : index
      %c0_11 = arith.constant 0 : index
      %12 = vector.load %arg10[%c0_10, %c0_11] : memref<16x128xf32, #tpu.memory_space<vmem>>, vector<16x128xf32>
      %c0_12 = arith.constant 0 : index
      %c0_13 = arith.constant 0 : index
      %13 = vector.load %arg5[%c0_12, %c0_13] : memref<1x128xf32, #tpu.memory_space<vmem>>, vector<1x128xf32>
      %14 = vector.broadcast %13 : vector<1x128xf32> to vector<16x128xf32>
      %15 = arith.addf %12, %14 : vector<16x128xf32>
      %c0_14 = arith.constant 0 : index
      %c0_15 = arith.constant 0 : index
      %16 = vector.load %arg8[%c0_14, %c0_15] : memref<16x128xf32, #tpu.memory_space<vmem>>, vector<16x128xf32>
      tpu.vector_store %arg8[%c0_14, %c0_15], %15 {strides = array<i32>} : memref<16x128xf32, #tpu.memory_space<vmem>>, vector<16x128xf32>,
      %c0_i32_16 = arith.constant 0 : i32
      %17 = arith.cmpi eq, %arg1, %c0_i32_16 : i32
      %18 = arith.extui %17 : i1 to i32
      %c0_i32_17 = arith.constant 0 : i32
      %19 = arith.cmpi ne, %18, %c0_i32_17 : i32
      scf.if %19 {
        %cst_38 = arith.constant -1.000000e+30 : f32
        %53 = vector.broadcast %cst_38 : f32 to vector<16x1xf32>
        %c0_39 = arith.constant 0 : index
        %c0_40 = arith.constant 0 : index
        %54 = vector.load %arg11[%c0_39, %c0_40] : memref<16x1xf32, #tpu.memory_space<vmem>>, vector<16x1xf32>
        tpu.vector_store %arg11[%c0_39, %c0_40], %53 {strides = array<i32>} : memref<16x1xf32, #tpu.memory_space<vmem>>, vector<16x1xf32>,
        %cst_41 = arith.constant 0.000000e+00 : f32
        %55 = vector.broadcast %cst_41 : f32 to vector<16x1xf32>
        %c0_42 = arith.constant 0 : index
        %c0_43 = arith.constant 0 : index
        %56 = vector.load %arg12[%c0_42, %c0_43] : memref<16x1xf32, #tpu.memory_space<vmem>>, vector<16x1xf32>
        tpu.vector_store %arg12[%c0_42, %c0_43], %55 {strides = array<i32>} : memref<16x1xf32, #tpu.memory_space<vmem>>, vector<16x1xf32>,
        %cst_44 = arith.constant 0.000000e+00 : f32
        %57 = vector.broadcast %cst_44 : f32 to vector<16x1xf32>
        %c0_45 = arith.constant 0 : index
        %c0_46 = arith.constant 0 : index
        %58 = vector.load %arg13[%c0_45, %c0_46] : memref<16x1xf32, #tpu.memory_space<vmem>>, vector<16x1xf32>
        tpu.vector_store %arg13[%c0_45, %c0_46], %57 {strides = array<i32>} : memref<16x1xf32, #tpu.memory_space<vmem>>, vector<16x1xf32>,
      } else {
      }
      %c0_18 = arith.constant 0 : index
      %c0_19 = arith.constant 0 : index
      %20 = vector.load %arg11[%c0_18, %c0_19] : memref<16x1xf32, #tpu.memory_space<vmem>>, vector<16x1xf32>
      %cst_20 = arith.constant dense<0xFF800000> : vector<16xf32>
      %21 = vector.multi_reduction <maximumf>, %15, %cst_20 [1] : vector<16x128xf32> to vector<16xf32>
      %22 = vector.shape_cast %21 : vector<16xf32> to vector<16x1xf32>
      %23 = arith.maximumf %20, %22 : vector<16x1xf32>
      %24 = arith.subf %20, %23 : vector<16x1xf32>
      %25 = math.exp %24 : vector<16x1xf32>
      %c0_21 = arith.constant 0 : index
      %c0_22 = arith.constant 0 : index
      %26 = vector.load %arg12[%c0_21, %c0_22] : memref<16x1xf32, #tpu.memory_space<vmem>>, vector<16x1xf32>
      %27 = arith.mulf %25, %26 : vector<16x1xf32>
      %28 = vector.broadcast %23 : vector<16x1xf32> to vector<16x128xf32>
      %29 = arith.subf %15, %28 : vector<16x128xf32>
      %30 = math.exp %29 : vector<16x128xf32>
      %cst_23 = arith.constant dense<0.000000e+00> : vector<16xf32>
      %31 = vector.multi_reduction <add>, %30, %cst_23 [1] : vector<16x128xf32> to vector<16xf32>
      %32 = vector.shape_cast %31 : vector<16xf32> to vector<16x1xf32>
      %33 = arith.addf %27, %32 : vector<16x1xf32>
      %c0_24 = arith.constant 0 : index
      %c0_25 = arith.constant 0 : index
      %34 = vector.load %arg12[%c0_24, %c0_25] : memref<16x1xf32, #tpu.memory_space<vmem>>, vector<16x1xf32>
      tpu.vector_store %arg12[%c0_24, %c0_25], %33 {strides = array<i32>} : memref<16x1xf32, #tpu.memory_space<vmem>>, vector<16x1xf32>,
      %c0_26 = arith.constant 0 : index
      %c0_27 = arith.constant 0 : index
      %35 = vector.load %arg11[%c0_26, %c0_27] : memref<16x1xf32, #tpu.memory_space<vmem>>, vector<16x1xf32>
      tpu.vector_store %arg11[%c0_26, %c0_27], %23 {strides = array<i32>} : memref<16x1xf32, #tpu.memory_space<vmem>>, vector<16x1xf32>,
      %c0_28 = arith.constant 0 : index
      %c0_29 = arith.constant 0 : index
      %36 = vector.load %arg6[%c0_28, %c0_29] : memref<16x1xi32, #tpu.memory_space<vmem>>, vector<16x1xi32>
      %37 = tpu.iota {dimensions = array<i32: 1>} : vector<16x128xi32>
      %c128_i32 = arith.constant 128 : i32
      %38 = arith.muli %arg1, %c128_i32 : i32
      %39 = vector.broadcast %38 : i32 to vector<16x128xi32>
      %40 = arith.addi %37, %39 : vector<16x128xi32>
      %c0_30 = arith.constant 0 : index
      %c0_31 = arith.constant 0 : index
      %41 = vector.load %arg13[%c0_30, %c0_31] : memref<16x1xf32, #tpu.memory_space<vmem>>, vector<16x1xf32>
      %42 = vector.broadcast %36 : vector<16x1xi32> to vector<16x128xi32>
      %43 = arith.cmpi eq, %40, %42 : vector<16x128xi32>
      %cst_32 = arith.constant 0.000000e+00 : f32
      %44 = vector.broadcast %cst_32 : f32 to vector<16x128xf32>
      %45 = arith.select %43, %15, %44 : vector<16x128xi1>, vector<16x128xf32>
      %cst_33 = arith.constant dense<0.000000e+00> : vector<16xf32>
      %46 = vector.multi_reduction <add>, %45, %cst_33 [1] : vector<16x128xf32> to vector<16xf32>
      %47 = vector.shape_cast %46 : vector<16xf32> to vector<16x1xf32>
      %48 = arith.addf %41, %47 : vector<16x1xf32>
      %c0_34 = arith.constant 0 : index
      %c0_35 = arith.constant 0 : index
      %49 = vector.load %arg13[%c0_34, %c0_35] : memref<16x1xf32, #tpu.memory_space<vmem>>, vector<16x1xf32>
      tpu.vector_store %arg13[%c0_34, %c0_35], %48 {strides = array<i32>} : memref<16x1xf32, #tpu.memory_space<vmem>>, vector<16x1xf32>,
      %c0_i32_36 = arith.constant 0 : i32
      %50 = arith.cmpi eq, %arg1, %c0_i32_36 : i32
      %51 = arith.extui %50 : i1 to i32
      %c0_i32_37 = arith.constant 0 : i32
      %52 = arith.cmpi ne, %51, %c0_i32_37 : i32
      scf.if %52 {
        %c0_38 = arith.constant 0 : index
        %c0_39 = arith.constant 0 : index
        %53 = vector.load %arg11[%c0_38, %c0_39] : memref<16x1xf32, #tpu.memory_space<vmem>>, vector<16x1xf32>
        %c0_40 = arith.constant 0 : index
        %c0_41 = arith.constant 0 : index
        %54 = vector.load %arg12[%c0_40, %c0_41] : memref<16x1xf32, #tpu.memory_space<vmem>>, vector<16x1xf32>
        %55 = math.log %54 : vector<16x1xf32>
        %56 = arith.addf %53, %55 : vector<16x1xf32>
        %c0_42 = arith.constant 0 : index
        %c0_43 = arith.constant 0 : index
        %57 = vector.load %arg13[%c0_42, %c0_43] : memref<16x1xf32, #tpu.memory_space<vmem>>, vector<16x1xf32>
        %58 = arith.subf %56, %57 : vector<16x1xf32>
        %c0_44 = arith.constant 0 : index
        %c0_45 = arith.constant 0 : index
        %59 = vector.load %arg7[%c0_44, %c0_45] : memref<16x1xf32, #tpu.memory_space<vmem>>, vector<16x1xf32>
        %60 = arith.mulf %58, %59 : vector<16x1xf32>
        %c0_46 = arith.constant 0 : index
        %c0_47 = arith.constant 0 : index
        %61 = vector.load %arg9[%c0_46, %c0_47] : memref<16x1xf32, #tpu.memory_space<vmem>>, vector<16x1xf32>
        tpu.vector_store %arg9[%c0_46, %c0_47], %60 {strides = array<i32>} : memref<16x1xf32, #tpu.memory_space<vmem>>, vector<16x1xf32>,
      } else {
      }
    } else {
    }
    return
  }
  func.func @transform_0(%arg0: i32, %arg1: i32, %arg2: i32) -> (i32, i32) {
    %c0_i32 = arith.constant 0 : i32
    return %arg0, %arg2 : i32, i32
  }
  func.func @transform_1(%arg0: i32, %arg1: i32, %arg2: i32) -> (i32, i32) {
    %c0_i32 = arith.constant 0 : i32
    return %arg2, %arg1 : i32, i32
  }
  func.func @transform_2(%arg0: i32, %arg1: i32, %arg2: i32) -> (i32, i32) {
    %c0_i32 = arith.constant 0 : i32
    %c0_i32_0 = arith.constant 0 : i32
    return %c0_i32, %arg1 : i32, i32
  }
  func.func @transform_3(%arg0: i32, %arg1: i32, %arg2: i32) -> (i32, i32) {
    %c0_i32 = arith.constant 0 : i32
    %c0_i32_0 = arith.constant 0 : i32
    return %arg0, %c0_i32 : i32, i32
  }
  func.func @transform_4(%arg0: i32, %arg1: i32, %arg2: i32) -> (i32, i32) {
    %c0_i32 = arith.constant 0 : i32
    %c0_i32_0 = arith.constant 0 : i32
    return %arg0, %c0_i32 : i32, i32
  }
  func.func @transform_5(%arg0: i32, %arg1: i32, %arg2: i32) -> (i32, i32) {
    %c0_i32 = arith.constant 0 : i32
    return %arg0, %arg1 : i32, i32
  }
  func.func @transform_6(%arg0: i32, %arg1: i32, %arg2: i32) -> (i32, i32) {
    %c0_i32 = arith.constant 0 : i32
    %c0_i32_0 = arith.constant 0 : i32
    return %arg0, %c0_i32 : i32, i32
  }
}

</mosaic_0001>

<bundles_post_ra>
// kernel: tpu_custom_call.1
= control target key start
LH: loop header
LB: loop body
LE: loop exit
PB: predicated region body
PF: predicated region fallthrough
CT: control target
= control target key end

     0   :  { %12 = vsyncpa [#allocation7], 0  ;;  %s533_s0 = inlined_call_operand.vmem [shape: bf16[16,128], index: 0, kind: input, shape index: {}]   ;;  %s534_s1 = inlined_call_operand.hbm [shape: bf16[128,128], index: 1, kind: input, shape index: {}]   ;;  %s535_s2 = inlined_call_operand.vmem [shape: f32[1,128], index: 2, kind: input, shape index: {}]   ;;  %s536_s3 = inlined_call_operand.vmem [shape: s32[16,1], index: 3, kind: input, shape index: {}]   ;;  %s537_s4 = inlined_call_operand.vmem [shape: f32[16,1], index: 4, kind: input, shape index: {}]   ;;  %s538_s5 = inlined_call_operand.hbm [shape: f32[16,128], index: 5, kind: output, shape index: {0}]   ;;  %s539_s6 = inlined_call_operand.vmem [shape: f32[16,1], index: 6, kind: output, shape index: {1}]  }
   0x1   :  { %13 = vsyncpa [#allocation8], 0  ;;  %s426_s21 = smov [#allocation6]   ;;  %s378_s25 = scalar_lea.hbm %s534_s1, 1024 }
   0x2   :  { %s21_s22 = sshll.u32 %s426_s21, 4  ;;  %p379_p0 = scmp.ne.s32.totalorder %s534_s1, %s378_s25  ;;  %s22_s22 = int_to_ptr.vmem [resolvable:$true] %s21_s22 }
   0x3   :  { %p382_p1 = scmp.lt.u32.totalorder %s378_s25, %s534_s1 }
   0x5   :  { %p384_p2 = pnand %p382_p1, %p379_p0 }
   0x7   :  { %387 = shalt.err (!%p384_p2)
}
   0x8   :  { %s388_s30 = scalar_lea.vmem %s22_s22, 1024  ;;  %p393_p4 = scmp.lt.s32.totalorder %s22_s22, %s22_s22 }
   0x9   :  { %p389_p3 = scmp.ne.s32.totalorder %s22_s22, %s388_s30  ;;  %p394_p5 = scmp.lt.s32.totalorder %s388_s30, %s388_s30 }
   0xb   :  { %p395_p6 = por %p394_p5, %p393_p4 }
   0xd   :  { %p396_p7 = pnand %p395_p6, %p389_p3 }
   0xf   :  { %399 = shalt.err (!%p396_p7)
}
  0x10   :  { %s427_s7 = smov 64   ;;  %s428_s8 = smov 4  }
  0x11   :  { %27 = dma.hbm_to_vmem [thread:$0]  %s534_s1, 1024, %s22_s22, [#allocation7], %s427_s7, %s427_s7, %s428_s8  }
  0x12   :  { %422 = dma.done.wait [#allocation7], 1024  }
  0x13   :  { %423 = vsyncadd [#allocation7], 4294966272  ;;  %v429_v0 = vmov 0.0   ;;  %vm430_vm0 = vmmov 0   ;;  %v357_v1 = vld [vmem:[#allocation6] sm:$0xff]   ;;  %v358_v2 = vld [vmem:[#allocation6 + $0x8] sm:$0xff]   ;;  %v237_v27 = vlaneseq }
  0x14   :  { %325 = vmatprep.subr.bf16.mxu0 %v429_v0  ;;  %341 = vmatprep.mubr.msk.bf16.mxu0 %vm430_vm0, %v429_v0  ;;  %v359_v3 = vld [vmem:[#allocation6 + $0x10] sm:$0xff]   ;;  %v360_v4 = vld [vmem:[#allocation6 + $0x18] sm:$0xff]   ;;  %v361_v5 = vld [vmem:[#allocation6 + $0x20] sm:$0xff]   ;;  %v431_v10 = vmov 0   ;;  %vm183_vm1 = vcmask 7168  }
  0x15   :  { %326 = vmatpush3.bf16.msra.mxu0 %v357_v1  ;;  %v362_v6 = vld [vmem:[#allocation6 + $0x28] sm:$0xff]   ;;  %v363_v7 = vld [vmem:[#allocation6 + $0x30] sm:$0xff]   ;;  %v364_v8 = vld [vmem:[#allocation6 + $0x38] sm:$0xff]   ;;  %356 = vset.pattern.permute.xlu0 %v431_v10  ;;  %v432_v11 = vmov -1e+30   ;;  %186 = vst.msk [vmem:[#allocation4] sm:$0xff] %vm183_vm1, %v429_v0 }
  0x16   :  { %327 = vmatprep.subr.bf16.mxu0 %v429_v0  ;;  %v365_v9 = vld [vmem:[%s533_s0] sm:$0xff]   ;;  %355 = vset.pattern.permute.xlu1 %v431_v10  ;;  %184 = vst.msk [vmem:[#allocation3] sm:$0xff] %vm183_vm1, %v432_v11  ;;  %185 = vst.msk [vmem:[#allocation3 + $0x8] sm:$0xff] %vm183_vm1, %v432_v11  ;;  %v236_v29 = vld [vmem:[%s536_s3 + $0x8] sm:$0xff]  ;;  %v238_v30 = vand.u32 127, %v237_v27 }
  0x17   :  { %187 = vst.msk [vmem:[#allocation4 + $0x8] sm:$0xff] %vm183_vm1, %v429_v0  ;;  %188 = vst.msk [vmem:[#allocation5] sm:$0xff] %vm183_vm1, %v429_v0  ;;  %v315_v12 = vld [vmem:[%s535_s2] ss:$0 sm:$0xff] }
  0x18   :  { %189 = vst.msk [vmem:[#allocation5 + $0x8] sm:$0xff] %vm183_vm1, %v429_v0  ;;  %v235_v19 = vld [vmem:[%s536_s3] sm:$0xff]  ;;  %s433_s3 = smov [#allocation9]  }
  0x19   :  { %328 = vmatpush3.bf16.msra.mxu0 %v358_v2  ;;  %s290_s16 = sshll.u32 %s433_s3, 4  ;;  %s291_s16 = int_to_ptr.vmem [resolvable:$true] %s290_s16 }
  0x1a   :  { %329 = vmatprep.subr.bf16.mxu0 %v429_v0  ;;  %s400_s17 = scalar_lea.vmem %s291_s16, 256  ;;  %p405_p9 = scmp.lt.s32.totalorder %s291_s16, %s291_s16 }
  0x1b   :  { %p401_p8 = scmp.ne.s32.totalorder %s291_s16, %s400_s17  ;;  %p406_p10 = scmp.lt.s32.totalorder %s400_s17, %s400_s17 }
  0x1d   :  { %330 = vmatpush3.bf16.msra.mxu0 %v359_v3  ;;  %v190_v20 = vld [vmem:[#allocation3] sm:$0xff]  ;;  %v191_v23 = vld [vmem:[#allocation3 + $0x8] sm:$0xff]  ;;  %p407_p11 = por %p406_p10, %p405_p9 }
  0x1e   :  { %331 = vmatprep.subr.bf16.mxu0 %v429_v0  ;;  %v242_v43 = vld [vmem:[#allocation5] sm:$0xff] }
  0x1f   :  { %p408_p12 = pnand %p407_p11, %p401_p8 }
  0x21   :  { %332 = vmatpush3.bf16.msra.mxu0 %v360_v4 }
  0x22   :  { %333 = vmatprep.subr.bf16.mxu0 %v429_v0 }
  0x25   :  { %334 = vmatpush3.bf16.msra.mxu0 %v361_v5 }
  0x26   :  { %335 = vmatprep.subr.bf16.mxu0 %v429_v0 }
  0x29   :  { %336 = vmatpush3.bf16.msra.mxu0 %v362_v6 }
  0x2a   :  { %337 = vmatprep.subr.bf16.mxu0 %v429_v0 }
  0x2d   :  { %338 = vmatpush3.bf16.msra.mxu0 %v363_v7 }
  0x2e   :  { %339 = vmatprep.subr.bf16.mxu0 %v429_v0 }
  0x31   :  { %340 = vmatpush3.bf16.msra.mxu0 %v364_v8 }
  0x34   :  { %342 = vmatmul.mubr.bf16.vlgmr.msra.gmra.mrb[0].mxu0 %v365_v9 }
 0x107   :  { %v152_v13 = vpop.f32.mrb[0].mxu0 }
 0x108   :  { %v175_v14 = vadd.f32 %v315_v12, %v152_v13  ;;  %v343_v15 = vpop.f32.mrb[1].mxu0 }
 0x109   :  { %v155_v16 = vpop.f32.mrb[2].mxu0 }
 0x10a   :  { %177 = vst [vmem:[#allocation9] sm:$0xff] %v175_v14  ;;  %v176_v17 = vadd.f32 %v315_v12, %v155_v16  ;;  %192 = vmax.xlane.f32.xlu0 %v175_v14  ;;  %v344_v18 = vpop.f32.mrb[3].mxu0 }
 0x10c   :  { %178 = vst [vmem:[#allocation9 + $0x8] sm:$0xff] %v176_v17 }
 0x10e   :  { %194 = vmax.xlane.f32.xlu0 %v176_v17 }
 0x124   :  { %245 = vperm.xlu0 %356, %v235_v19  }
 0x197   :  { %v193_v21 = vpop.xlane.xlu0 %192 }
 0x198   :  { %v196_v22 = vmax.f32 %v190_v20, %v193_v21 }
 0x19a   :  { %v198_v24 = vsub.f32 %v190_v20, %v196_v22  ;;  %233 = vst.msk [vmem:[#allocation3] sm:$0xff] %vm183_vm1, %v196_v22  ;;  %210 = vperm.xlu1 %355, %v196_v22  }
 0x19b   :  { %v195_v25 = vpop.xlane.xlu0 %194 }
 0x19c   :  { %v197_v26 = vmax.f32 %v191_v23, %v195_v25 }
 0x19e   :  { %v199_v28 = vsub.f32 %v191_v23, %v197_v26  ;;  %234 = vst.msk [vmem:[#allocation3 + $0x8] sm:$0xff] %vm183_vm1, %v197_v26  ;;  %215 = vperm.xlu1 %355, %v197_v26  }
 0x1a2   :  { %248 = vperm.xlu1 %355, %v236_v29  }
 0x1a3   :  { %v246_v31 = vpop.permute.xlu0 %245 }
 0x1a4   :  { %vm250_vm2 = vcmp.eq.s32.totalorder %v238_v30, %v246_v31 }
 0x1a5   :  { %v252_v32 = vsel %vm250_vm2, %v175_v14, 0.0 }
 0x1a6   :  { %254 = vadd.xlane.f32.xlu0 %v252_v32 }
 0x219   :  { %v211_v33 = vpop.permute.xlu1 %210 }
 0x21a   :  { %v218_v34 = vsub.f32 %v175_v14, %v211_v33 }
 0x21c   :  { %v220_v35 = vmul.f32 1.442695, %v218_v34 }
 0x21d   :  { %v216_v36 = vpop.permute.xlu1 %215 }
 0x21e   :  { %366 = vpow2.f32 %v220_v35  ;;  %v219_v37 = vsub.f32 %v176_v17, %v216_v36 }
 0x220   :  { %v222_v38 = vmul.f32 1.442695, %v219_v37 }
 0x221   :  { %v249_v40 = vpop.permute.xlu1 %248 }
 0x222   :  { %368 = vpow2.f32 %v222_v38  ;;  %vm251_vm3 = vcmp.eq.s32.totalorder %v238_v30, %v249_v40 }
 0x223   :  { %v253_v42 = vsel %vm251_vm3, %v176_v17, 0.0 }
 0x228   :  { %v367_v39 = vpop.eup %366 }
 0x229   :  { %224 = vadd.xlane.f32.xlu1 %v367_v39 }
 0x22c   :  { %v369_v41 = vpop.eup %368 }
 0x22d   :  { %226 = vadd.xlane.f32.xlu1 %v369_v41 }
 0x231   :  { %256 = vadd.xlane.f32.xlu1 %v253_v42 }
 0x233   :  { %v255_v44 = vpop.xlane.xlu0 %254 }
 0x234   :  { %v258_v45 = vadd.f32 %v255_v44, %v242_v43 }
 0x236   :  { %260 = vst.msk [vmem:[#allocation5] sm:$0xff] %vm183_vm1, %v258_v45 }
 0x237   :  { %411 = shalt.err (!%p408_p12)
}
 0x238   :  { %s412_s20 = scalar_lea.hbm %s538_s5, 256 }
 0x239   :  { %p413_p13 = scmp.ne.s32.totalorder %s538_s5, %s412_s20  ;;  %p416_p0 = scmp.lt.u32.totalorder %s412_s20, %s538_s5 }
 0x23b   :  { %p418_p1 = pnand %p416_p0, %p413_p13 }
 0x23d   :  { %421 = shalt.err (!%p418_p1)
}
 0x23e   :  { %s434_s25 = smov 128   ;;  %s435_s26 = smov 8   ;;  %v200_v46 = vmul.f32 1.442695, %v198_v24  ;;  %v202_v47 = vmul.f32 1.442695, %v199_v28 }
 0x23f   :  { %296 = dma.vmem_to_hbm [thread:$0]  %s291_s16, 256, %s538_s5, [#allocation8], %s434_s25, %s434_s25, %s435_s26   ;;  %v204_v49 = vld [vmem:[#allocation4] sm:$0xff]  ;;  %v205_v53 = vld [vmem:[#allocation4 + $0x8] sm:$0xff]  ;;  %v243_v58 = vld [vmem:[#allocation5 + $0x8] sm:$0xff] }
 0x240   :  { %370 = vpow2.f32 %v200_v46  ;;  %v265_v1 = vld [vmem:[#allocation3] sm:$0xff]  ;;  %v266_v8 = vld [vmem:[#allocation3 + $0x8] sm:$0xff] }
 0x241   :  { %372 = vpow2.f32 %v202_v47  ;;  %v275_v4 = vld [vmem:[#allocation5] sm:$0xff]  ;;  %v280_v11 = vld [vmem:[%s537_s4 + $0x8] sm:$0xff] }
 0x242   :  { %v279_v5 = vld [vmem:[%s537_s4] sm:$0xff] }
 0x24a   :  { %v371_v48 = vpop.eup %370 }
 0x24b   :  { %v206_v50 = vmul.f32 %v371_v48, %v204_v49  ;;  %v373_v51 = vpop.eup %372 }
 0x24c   :  { %v207_v55 = vmul.f32 %v373_v51, %v205_v53 }
 0x2b6   :  { %v225_v52 = vpop.xlane.xlu1 %224 }
 0x2b7   :  { %v228_v54 = vadd.f32 %v225_v52, %v206_v50 }
 0x2b9   :  { %231 = vst.msk [vmem:[#allocation4] sm:$0xff] %vm183_vm1, %v228_v54 }
 0x2ba   :  { %v227_v56 = vpop.xlane.xlu1 %226 }
 0x2bb   :  { %v229_v57 = vadd.f32 %v227_v56, %v207_v55 }
 0x2bd   :  { %232 = vst.msk [vmem:[#allocation4 + $0x8] sm:$0xff] %vm183_vm1, %v229_v57 }
 0x2be   :  { %v257_v59 = vpop.xlane.xlu1 %256 }
 0x2bf   :  { %v259_v60 = vadd.f32 %v257_v59, %v243_v58 }
 0x2c0   :  { %v267_v61 = vld [vmem:[#allocation4] sm:$0xff] }
 0x2c1   :  { %374 = vlog2.f32 %v267_v61  ;;  %261 = vst.msk [vmem:[#allocation5 + $0x8] sm:$0xff] %vm183_vm1, %v259_v60 }
 0x2c4   :  { %v268_v62 = vld [vmem:[#allocation4 + $0x8] sm:$0xff] }
 0x2c5   :  { %376 = vlog2.f32 %v268_v62 }
 0x2c8   :  { %v276_v12 = vld [vmem:[#allocation5 + $0x8] sm:$0xff] }
 0x2cb   :  { %v375_v63 = vpop.eup %374 }
 0x2cc   :  { %v270_v0 = vmul.f32 0.6931472, %v375_v63 }
 0x2ce   :  { %v273_v2 = vadd.f32 %v270_v0, %v265_v1 }
 0x2cf   :  { %v377_v3 = vpop.eup %376 }
 0x2d0   :  { %v277_v6 = vsub.f32 %v273_v2, %v275_v4  ;;  %v272_v7 = vmul.f32 0.6931472, %v377_v3 }
 0x2d2   :  { %v281_v9 = vmul.f32 %v279_v5, %v277_v6  ;;  %v274_v10 = vadd.f32 %v272_v7, %v266_v8 }
 0x2d4   :  { %283 = vst.msk [vmem:[%s539_s6] sm:$0xff] %vm183_vm1, %v281_v9  ;;  %v278_v13 = vsub.f32 %v274_v10, %v276_v12 }
 0x2d6   :  { %v282_v14 = vmul.f32 %v280_v11, %v278_v13 }
 0x2d8   :  { %284 = vst.msk [vmem:[%s539_s6 + $0x8] sm:$0xff] %vm183_vm1, %v282_v14 }
 0x2d9   :  { %424 = dma.done.wait [#allocation8], 256  }
 0x2da   :  { %425 = vsyncadd [#allocation8], 4294967040 }
 0x2db   :  { %304 = vsyncpa [#allocation7], 1 }
 0x2dc   :  { %305 = vsyncpa [#allocation8], 1 }

</bundles_post_ra>
